<compile_context>
chip_gen: v7x
topology: tpu7x:2x2x1
jax: 0.10.0
libtpu: 0.0.40
codegen_flags: <defaults>
</compile_context>

<pallas_src>
import jax
import jax.numpy as jnp
from jax.experimental import pallas as pl
from jax.experimental.pallas import tpu as pltpu


def _softplus(x):
    # numerically stable softplus;  -logsigmoid(x) == softplus(-x)
    return jnp.maximum(x, 0.0) + jnp.log1p(jnp.exp(-jnp.abs(x)))


def _round_up(x, m):
    return ((x + m - 1) // m) * m


def _device_defaults():
    """(vmem_capacity_bytes, has_two_tensorcores) with safe fallbacks."""
    vmem_cap = 128 * 1024 * 1024
    two_tc = False
    try:
        info = pltpu.get_tpu_info()
        vmem_cap = int(getattr(info, "vmem_capacity_bytes", vmem_cap))
    except Exception:
        pass
    try:
        kind = jax.devices()[0].device_kind.lower()
        # v4 / v7x expose two TensorCores per device; v5e/v6e are single-TC.
        two_tc = ("v4" in kind) or ("v7" in kind)
    except Exception:
        pass
    return vmem_cap, two_tc


def embedding_loss_mlp(query_emb, query_emb_neg, answer_emb, answer_emb_neg,
                       params, *, tile_rows=1024, num_shards=None,
                       compute_dtype=None):
    """Pallas EmbeddingLossMLP forward.

    params = (w1 (2D,H), b1 (H,), w2 (H,1), b2 ()) of the LinkPredictorMLP.
    compute_dtype: MXU operand dtype for layer 1 (None -> follow the
    embedding dtype, f32 otherwise); accumulation / post-matmul math are f32.
    """
    w1, b1, w2, b2 = params
    B, K, D = query_emb_neg.shape
    H = w1.shape[1]
    n_neg = B * K

    # ---- free reshape of the dominant stream (no concat / pad / cast) ------
    q_neg = query_emb_neg.reshape(n_neg, D)
    a_neg = answer_emb_neg.reshape(n_neg, D)

    in_dtype = q_neg.dtype
    if compute_dtype is None:
        compute = jnp.bfloat16 if in_dtype == jnp.bfloat16 else jnp.float32
    else:
        compute = jnp.dtype(compute_dtype)
    in_isz = jnp.dtype(in_dtype).itemsize
    c_isz = jnp.dtype(compute).itemsize

    # ---- generation-aware knobs --------------------------------------------
    vmem_cap, two_tc = _device_defaults()
    if num_shards is None:
        num_shards = 2 if two_tc else 1
    num_shards = max(1, int(num_shards))
    # ~96 MiB on 128-MiB VMEM parts (v5e/v6e), ~48 MiB on 64-MiB v7x.
    vmem_limit = int(min(96 * 1024 * 1024, max(32 * 1024 * 1024, vmem_cap * 3 // 4)))

    # ---- VMEM budget -> row-tile size ---------------------------------------
    # Resident blocks (double-buffered by the pipeline even with constant
    # index maps; single-buffering constant weights would free half of this).
    fixed = 2 * (2 * D * H * c_isz)                 # W1[:D], W1[D:]
    fixed += 2 * 2 * max(H, 128) * 4                # b1, w2^T rows
    fixed += 2 * 2 * B * D * in_isz                 # resident positive pairs
    fixed += 4 * 1024 * 1024                        # compiler scratch / misc slack

    per_row = 2 * 2 * D * in_isz                    # q + a tiles, double-buffered
    per_row += 2 * H * 4                            # (tm, H) f32 hidden temporary
    per_row += 2 * 128 * 4                          # narrow (tm,1) temporaries (lane-padded)
    if c_isz != in_isz:
        per_row += 2 * D * c_isz                    # in-kernel cast copies

    avail = max(vmem_limit - fixed, 1 << 20)
    tm_cap = max(8, avail // per_row)

    # sub-32-bit operands pack 2/4 rows per sublane -> align rows accordingly
    row_align = max(8, 32 // min(in_isz, c_isz))
    tm = min(int(tile_rows), int(tm_cap))
    tm = min(tm, _round_up(pl.cdiv(n_neg, num_shards), row_align))
    tm = max(row_align, (tm // row_align) * row_align)

    num_shards = max(1, min(num_shards, pl.cdiv(n_neg, tm)))
    tiles_per_shard = pl.cdiv(n_neg, num_shards * tm)
    last_block = pl.cdiv(n_neg, tm) - 1             # clamp target for ragged tail

    pos_w = 0.5 / B                                  # 0.5 * mean over batch
    neg_w = 0.5 / (B * K)                            # 0.5 * mean-of-means over negatives

    # ---- small one-time parameter prep (no full-stream passes) --------------
    w1q = w1[:D].astype(compute)                     # (D, H)
    w1a = w1[D:].astype(compute)                     # (D, H)
    b1_2d = b1.reshape(1, H).astype(jnp.float32)
    w2_row = w2.reshape(1, H).astype(jnp.float32)    # w2^T as a lane vector
    b2_2d = jnp.asarray(b2, jnp.float32).reshape(1, 1)

    def kernel(qn_ref, an_ref, qp_ref, ap_ref,
               w1q_ref, w1a_ref, b1_ref, w2_ref, b2_ref,
               out_ref, acc_ref):
        c = pl.program_id(0)
        t = pl.program_id(1)

        @pl.when(t == 0)
        def _init():
            acc_ref[...] = jnp.zeros_like(acc_ref)

        def score(q, a):
            # layer 1 on the MXU: concat([q, a]) @ W1 == q @ W1[:D] + a @ W1[D:]
            h = jnp.dot(q.astype(compute), w1q_ref[...],
                        preferred_element_type=jnp.float32)
            h = h + jnp.dot(a.astype(compute), w1a_ref[...],
                            preferred_element_type=jnp.float32)
            h = jnp.maximum(h + b1_ref[...], 0.0)
            # layer 2 (output width 1): VPU multiply + lane reduction
            return jnp.sum(h * w2_ref[...], axis=-1, keepdims=True) + b2_ref[0, 0]

        # ---- positive pairs (B rows): once, first tile of shard 0 ----------
        @pl.when(jnp.logical_and(c == 0, t == 0))
        def _pos():
            s_pos = score(qp_ref[...], ap_ref[...])                  # (B, 1)
            acc_ref[...] += pos_w * jnp.sum(_softplus(-s_pos))

        # ---- one tile of the negative stream --------------------------------
        s_neg = score(qn_ref[...], an_ref[...])                      # (tm, 1)
        row0 = (c * tiles_per_shard + t) * tm
        rows = row0 + jax.lax.broadcasted_iota(jnp.int32, (tm, 1), 0)
        # select (not multiply) so garbage in the ragged tail can't make NaN
        loss = jnp.where(rows < n_neg, _softplus(s_neg), 0.0)
        acc_ref[...] += neg_w * jnp.sum(loss)

        @pl.when(t == tiles_per_shard - 1)
        def _fin():
            out_ref[...] = acc_ref[...]

    # clamp the stream block index so no DMA starts fully out of bounds;
    # the kernel masks by the *intended* (unclamped) global row index.
    row_map = lambda c, t: (jnp.minimum(c * tiles_per_shard + t, last_block), 0)
    const_map = lambda c, t: (0, 0)

    partials = pl.pallas_call(
        kernel,
        out_shape=jax.ShapeDtypeStruct((num_shards, 1, 1), jnp.float32),
        grid=(num_shards, tiles_per_shard),
        in_specs=[
            pl.BlockSpec((tm, D), row_map),                    # negative query rows
            pl.BlockSpec((tm, D), row_map),                    # negative answer rows
            pl.BlockSpec((B, D), const_map),                   # positive queries (resident)
            pl.BlockSpec((B, D), const_map),                   # positive answers (resident)
            pl.BlockSpec((D, H), const_map),                   # W1[:D]  (resident)
            pl.BlockSpec((D, H), const_map),                   # W1[D:]  (resident)
            pl.BlockSpec((1, H), const_map),                   # b1      (resident)
            pl.BlockSpec((1, H), const_map),                   # w2^T    (resident)
            pl.BlockSpec(memory_space=pltpu.MemorySpace.SMEM), # b2 scalar
        ],
        out_specs=pl.BlockSpec((1, 1, 1), lambda c, t: (c, 0, 0)),
        scratch_shapes=[pltpu.VMEM((1, 1, 1), jnp.float32)],   # per-shard accumulator
        compiler_params=pltpu.CompilerParams(
            dimension_semantics=("parallel", "arbitrary"),
            vmem_limit_bytes=vmem_limit),
    )(q_neg, a_neg, query_emb, answer_emb, w1q, w1a, b1_2d, w2_row, b2_2d)

    # per-shard partials already carry the 0.5/B and 0.5/(B*K) weights
    return jnp.sum(partials)


def reference_loss(query_emb, query_emb_neg, answer_emb, answer_emb_neg, params):
    """Pure-JAX transcription of the PyTorch forward, for verification."""
    w1, b1, w2, b2 = params
    B, K, D = query_emb_neg.shape

    def ranker(q, a):
        x = jnp.concatenate([q, a], axis=-1)
        h = jax.nn.relu(x @ w1 + b1)
        return (h @ w2)[:, 0] + b2

    loss_pos = -jax.nn.log_sigmoid(ranker(query_emb, answer_emb))
    s_neg = ranker(query_emb_neg.reshape(-1, D), answer_emb_neg.reshape(-1, D))
    loss_neg = jnp.mean((-jax.nn.log_sigmoid(-s_neg)).reshape(-1, K), axis=1)
    return jnp.mean(0.5 * (loss_pos + loss_neg))


if __name__ == "__main__":
    # small, lane-friendly shapes
    B, K, D, H = 8, 4, 128, 128

    key = jax.random.PRNGKey(0)
    kq, kqn, ka, kan, kw1, kb1, kw2, kb2 = jax.random.split(key, 8)

    query_emb = jax.random.normal(kq, (B, D), dtype=jnp.float32)
    query_emb_neg = jax.random.normal(kqn, (B, K, D), dtype=jnp.float32)
    answer_emb = jax.random.normal(ka, (B, D), dtype=jnp.float32)
    answer_emb_neg = jax.random.normal(kan, (B, K, D), dtype=jnp.float32)

    # deterministic LinkPredictorMLP parameters (2-layer MLP: 2D -> H -> 1)
    w1 = 0.05 * jax.random.normal(kw1, (2 * D, H), dtype=jnp.float32)
    b1 = 0.05 * jax.random.normal(kb1, (H,), dtype=jnp.float32)
    w2 = 0.05 * jax.random.normal(kw2, (H, 1), dtype=jnp.float32)
    b2 = 0.05 * jax.random.normal(kb2, (), dtype=jnp.float32)
    params = (w1, b1, w2, b2)

    ref = reference_loss(query_emb, query_emb_neg, answer_emb,
                         answer_emb_neg, params)

    # f32 path: tight tolerance
    loss_f32 = embedding_loss_mlp(query_emb, query_emb_neg, answer_emb,
                                  answer_emb_neg, params)
    jax.block_until_ready(loss_f32)
    assert jnp.allclose(loss_f32, ref, rtol=1e-5, atol=1e-5), (loss_f32, ref)

    # "producer emits bf16" path: bf16 stream from HBM, f32 accumulation
    loss_bf16 = embedding_loss_mlp(query_emb.astype(jnp.bfloat16),
                                   query_emb_neg.astype(jnp.bfloat16),
                                   answer_emb.astype(jnp.bfloat16),
                                   answer_emb_neg.astype(jnp.bfloat16),
                                   params)
    jax.block_until_ready(loss_bf16)
    assert jnp.allclose(loss_bf16, ref, rtol=5e-2, atol=5e-2), (loss_bf16, ref)

    print("KERNEL_OK")
</pallas_src>

<mosaic_0001>
module attributes {stable_mosaic.version = 11 : i64} {
  func.func @kernel(%arg0: i32, %arg1: i32, %arg2: memref<32x128xf32, #tpu.memory_space<vmem>>, %arg3: memref<32x128xf32, #tpu.memory_space<vmem>>, %arg4: memref<8x128xf32, #tpu.memory_space<vmem>>, %arg5: memref<8x128xf32, #tpu.memory_space<vmem>>, %arg6: memref<128x128xf32, #tpu.memory_space<vmem>>, %arg7: memref<128x128xf32, #tpu.memory_space<vmem>>, %arg8: memref<1x128xf32, #tpu.memory_space<vmem>>, %arg9: memref<1x128xf32, #tpu.memory_space<vmem>>, %arg10: memref<1x1xf32, #tpu.memory_space<smem>>, %arg11: memref<1x1x1xf32, #tpu.memory_space<vmem>>, %arg12: memref<1x1x1xf32, #tpu.memory_space<vmem>>) attributes {dimension_semantics = [#tpu.dimension_semantics<parallel>, #tpu.dimension_semantics<arbitrary>], iteration_bounds = array<i64: 1, 1>, scalar_prefetch = 0 : i64, scratch_operands = 1 : i64, tpu.core_type = #tpu.core_type<tc>, window_params = [{transform_indices = @transform_0, window_bounds = array<i64: 32, 128>}, {transform_indices = @transform_1, window_bounds = array<i64: 32, 128>}, {pipeline_mode = #tpu.pipeline_mode<synchronous>, transform_indices = @transform_2, window_bounds = array<i64: 8, 128>}, {pipeline_mode = #tpu.pipeline_mode<synchronous>, transform_indices = @transform_3, window_bounds = array<i64: 8, 128>}, {pipeline_mode = #tpu.pipeline_mode<synchronous>, transform_indices = @transform_4, window_bounds = array<i64: 128, 128>}, {pipeline_mode = #tpu.pipeline_mode<synchronous>, transform_indices = @transform_5, window_bounds = array<i64: 128, 128>}, {pipeline_mode = #tpu.pipeline_mode<synchronous>, transform_indices = @transform_6, window_bounds = array<i64: 1, 128>}, {pipeline_mode = #tpu.pipeline_mode<synchronous>, transform_indices = @transform_7, window_bounds = array<i64: 1, 128>}, {transform_indices = @transform_8, window_bounds = array<i64: 1, 1>}, {transform_indices = @transform_9, window_bounds = array<i64: 1, 1, 1>}]} {
    %c0_i32 = arith.constant 0 : i32
    %0 = arith.cmpi eq, %arg1, %c0_i32 : i32
    %1 = arith.extui %0 : i1 to i32
    %c0_i32_0 = arith.constant 0 : i32
    %2 = arith.cmpi ne, %1, %c0_i32_0 : i32
    scf.if %2 {
      %cst_34 = arith.constant 0.000000e+00 : f32
      %58 = vector.broadcast %cst_34 : f32 to vector<1x1x1xf32>
      %c0_35 = arith.constant 0 : index
      %c0_36 = arith.constant 0 : index
      %c0_37 = arith.constant 0 : index
      %59 = vector.load %arg12[%c0_35, %c0_36, %c0_37] : memref<1x1x1xf32, #tpu.memory_space<vmem>>, vector<1x1x1xf32>
      tpu.vector_store %arg12[%c0_35, %c0_36, %c0_37], %58 {strides = array<i32>} : memref<1x1x1xf32, #tpu.memory_space<vmem>>, vector<1x1x1xf32>,
    } else {
    }
    %c0_i32_1 = arith.constant 0 : i32
    %3 = arith.cmpi eq, %arg0, %c0_i32_1 : i32
    %c0_i32_2 = arith.constant 0 : i32
    %4 = arith.cmpi eq, %arg1, %c0_i32_2 : i32
    %5 = arith.andi %3, %4 : i1
    %6 = arith.extui %5 : i1 to i32
    %c0_i32_3 = arith.constant 0 : i32
    %7 = arith.cmpi ne, %6, %c0_i32_3 : i32
    scf.if %7 {
      %c0_34 = arith.constant 0 : index
      %c0_35 = arith.constant 0 : index
      %58 = vector.load %arg4[%c0_34, %c0_35] : memref<8x128xf32, #tpu.memory_space<vmem>>, vector<8x128xf32>
      %c0_36 = arith.constant 0 : index
      %c0_37 = arith.constant 0 : index
      %59 = vector.load %arg5[%c0_36, %c0_37] : memref<8x128xf32, #tpu.memory_space<vmem>>, vector<8x128xf32>
      %c0_38 = arith.constant 0 : index
      %c0_39 = arith.constant 0 : index
      %60 = vector.load %arg6[%c0_38, %c0_39] : memref<128x128xf32, #tpu.memory_space<vmem>>, vector<128x128xf32>
      %cst_40 = arith.constant dense<0.000000e+00> : vector<8x128xf32>
      %61 = tpu.matmul %58, %60, %cst_40 {dimension_numbers = #tpu.dot_dimension_numbers<[1], [0], [0], [1], [0, 0, 1, 1], [], []>} : vector<8x128xf32>, vector<128x128xf32>, vector<8x128xf32> -> vector<8x128xf32>
      %c0_41 = arith.constant 0 : index
      %c0_42 = arith.constant 0 : index
      %62 = vector.load %arg7[%c0_41, %c0_42] : memref<128x128xf32, #tpu.memory_space<vmem>>, vector<128x128xf32>
      %cst_43 = arith.constant dense<0.000000e+00> : vector<8x128xf32>
      %63 = tpu.matmul %59, %62, %cst_43 {dimension_numbers = #tpu.dot_dimension_numbers<[1], [0], [0], [1], [0, 0, 1, 1], [], []>} : vector<8x128xf32>, vector<128x128xf32>, vector<8x128xf32> -> vector<8x128xf32>
      %64 = arith.addf %61, %63 : vector<8x128xf32>
      %c0_44 = arith.constant 0 : index
      %c0_45 = arith.constant 0 : index
      %65 = vector.load %arg8[%c0_44, %c0_45] : memref<1x128xf32, #tpu.memory_space<vmem>>, vector<1x128xf32>
      %66 = vector.broadcast %65 : vector<1x128xf32> to vector<8x128xf32>
      %67 = arith.addf %64, %66 : vector<8x128xf32>
      %cst_46 = arith.constant 0.000000e+00 : f32
      %68 = vector.broadcast %cst_46 : f32 to vector<8x128xf32>
      %69 = arith.maximumf %67, %68 : vector<8x128xf32>
      %c0_47 = arith.constant 0 : index
      %c0_48 = arith.constant 0 : index
      %70 = vector.load %arg9[%c0_47, %c0_48] : memref<1x128xf32, #tpu.memory_space<vmem>>, vector<1x128xf32>
      %71 = vector.broadcast %70 : vector<1x128xf32> to vector<8x128xf32>
      %72 = arith.mulf %69, %71 : vector<8x128xf32>
      %cst_49 = arith.constant dense<0.000000e+00> : vector<8xf32>
      %73 = vector.multi_reduction <add>, %72, %cst_49 [1] : vector<8x128xf32> to vector<8xf32>
      %74 = vector.shape_cast %73 : vector<8xf32> to vector<8x1xf32>
      %c0_50 = arith.constant 0 : index
      %c0_51 = arith.constant 0 : index
      %75 = memref.load %arg10[%c0_50, %c0_51] : memref<1x1xf32, #tpu.memory_space<smem>>
      %76 = vector.broadcast %75 : f32 to vector<8x1xf32>
      %77 = arith.addf %74, %76 : vector<8x1xf32>
      %c0_52 = arith.constant 0 : index
      %c0_53 = arith.constant 0 : index
      %c0_54 = arith.constant 0 : index
      %78 = vector.load %arg12[%c0_52, %c0_53, %c0_54] : memref<1x1x1xf32, #tpu.memory_space<vmem>>, vector<1x1x1xf32>
      %cst_55 = arith.constant 0.000000e+00 : f32
      %79 = vector.broadcast %cst_55 : f32 to vector<8x1xf32>
      %80 = arith.subf %79, %77 : vector<8x1xf32>
      %cst_56 = arith.constant 0.000000e+00 : f32
      %81 = vector.broadcast %cst_56 : f32 to vector<8x1xf32>
      %82 = arith.maximumf %80, %81 : vector<8x1xf32>
      %83 = math.absf %80 : vector<8x1xf32>
      %cst_57 = arith.constant 0.000000e+00 : f32
      %84 = vector.broadcast %cst_57 : f32 to vector<8x1xf32>
      %85 = arith.subf %84, %83 : vector<8x1xf32>
      %86 = math.exp %85 : vector<8x1xf32>
      %87 = math.log1p %86 : vector<8x1xf32>
      %88 = arith.addf %82, %87 : vector<8x1xf32>
      %89 = vector.shape_cast %88 : vector<8x1xf32> to vector<1x8x1xf32>
      %cst_58 = arith.constant dense<0.000000e+00> : vector<1xf32>
      %90 = vector.multi_reduction <add>, %89, %cst_58 [1, 2] : vector<1x8x1xf32> to vector<1xf32>
      %91 = vector.shape_cast %90 : vector<1xf32> to vector<1x1x1xf32>
      %92 = vector.extract %91[0, 0, 0] : f32 from vector<1x1x1xf32>
      %cst_59 = arith.constant 6.250000e-02 : f32
      %93 = arith.mulf %cst_59, %92 : f32
      %94 = vector.broadcast %93 : f32 to vector<1x1x1xf32>
      %95 = arith.addf %78, %94 : vector<1x1x1xf32>
      %c0_60 = arith.constant 0 : index
      %c0_61 = arith.constant 0 : index
      %c0_62 = arith.constant 0 : index
      %96 = vector.load %arg12[%c0_60, %c0_61, %c0_62] : memref<1x1x1xf32, #tpu.memory_space<vmem>>, vector<1x1x1xf32>
      tpu.vector_store %arg12[%c0_60, %c0_61, %c0_62], %95 {strides = array<i32>} : memref<1x1x1xf32, #tpu.memory_space<vmem>>, vector<1x1x1xf32>,
    } else {
    }
    %c0 = arith.constant 0 : index
    %c0_4 = arith.constant 0 : index
    %8 = vector.load %arg2[%c0, %c0_4] : memref<32x128xf32, #tpu.memory_space<vmem>>, vector<32x128xf32>
    %c0_5 = arith.constant 0 : index
    %c0_6 = arith.constant 0 : index
    %9 = vector.load %arg3[%c0_5, %c0_6] : memref<32x128xf32, #tpu.memory_space<vmem>>, vector<32x128xf32>
    %c0_7 = arith.constant 0 : index
    %c0_8 = arith.constant 0 : index
    %10 = vector.load %arg6[%c0_7, %c0_8] : memref<128x128xf32, #tpu.memory_space<vmem>>, vector<128x128xf32>
    %cst = arith.constant dense<0.000000e+00> : vector<32x128xf32>
    %11 = tpu.matmul %8, %10, %cst {dimension_numbers = #tpu.dot_dimension_numbers<[1], [0], [0], [1], [0, 0, 1, 1], [], []>} : vector<32x128xf32>, vector<128x128xf32>, vector<32x128xf32> -> vector<32x128xf32>
    %c0_9 = arith.constant 0 : index
    %c0_10 = arith.constant 0 : index
    %12 = vector.load %arg7[%c0_9, %c0_10] : memref<128x128xf32, #tpu.memory_space<vmem>>, vector<128x128xf32>
    %cst_11 = arith.constant dense<0.000000e+00> : vector<32x128xf32>
    %13 = tpu.matmul %9, %12, %cst_11 {dimension_numbers = #tpu.dot_dimension_numbers<[1], [0], [0], [1], [0, 0, 1, 1], [], []>} : vector<32x128xf32>, vector<128x128xf32>, vector<32x128xf32> -> vector<32x128xf32>
    %14 = arith.addf %11, %13 : vector<32x128xf32>
    %c0_12 = arith.constant 0 : index
    %c0_13 = arith.constant 0 : index
    %15 = vector.load %arg8[%c0_12, %c0_13] : memref<1x128xf32, #tpu.memory_space<vmem>>, vector<1x128xf32>
    %16 = vector.broadcast %15 : vector<1x128xf32> to vector<32x128xf32>
    %17 = arith.addf %14, %16 : vector<32x128xf32>
    %cst_14 = arith.constant 0.000000e+00 : f32
    %18 = vector.broadcast %cst_14 : f32 to vector<32x128xf32>
    %19 = arith.maximumf %17, %18 : vector<32x128xf32>
    %c0_15 = arith.constant 0 : index
    %c0_16 = arith.constant 0 : index
    %20 = vector.load %arg9[%c0_15, %c0_16] : memref<1x128xf32, #tpu.memory_space<vmem>>, vector<1x128xf32>
    %21 = vector.broadcast %20 : vector<1x128xf32> to vector<32x128xf32>
    %22 = arith.mulf %19, %21 : vector<32x128xf32>
    %cst_17 = arith.constant dense<0.000000e+00> : vector<32xf32>
    %23 = vector.multi_reduction <add>, %22, %cst_17 [1] : vector<32x128xf32> to vector<32xf32>
    %24 = vector.shape_cast %23 : vector<32xf32> to vector<32x1xf32>
    %c0_18 = arith.constant 0 : index
    %c0_19 = arith.constant 0 : index
    %25 = memref.load %arg10[%c0_18, %c0_19] : memref<1x1xf32, #tpu.memory_space<smem>>
    %26 = vector.broadcast %25 : f32 to vector<32x1xf32>
    %27 = arith.addf %24, %26 : vector<32x1xf32>
    %c1_i32 = arith.constant 1 : i32
    %28 = arith.muli %arg0, %c1_i32 : i32
    %29 = arith.addi %28, %arg1 : i32
    %c32_i32 = arith.constant 32 : i32
    %30 = arith.muli %29, %c32_i32 : i32
    %31 = tpu.iota {dimensions = array<i32: 0>} : vector<32x1xi32>
    %32 = vector.broadcast %30 : i32 to vector<32x1xi32>
    %33 = arith.addi %32, %31 : vector<32x1xi32>
    %c32_i32_20 = arith.constant 32 : i32
    %34 = vector.broadcast %c32_i32_20 : i32 to vector<32x1xi32>
    %35 = arith.cmpi slt, %33, %34 : vector<32x1xi32>
    %cst_21 = arith.constant 0.000000e+00 : f32
    %36 = vector.broadcast %cst_21 : f32 to vector<32x1xf32>
    %37 = arith.maximumf %27, %36 : vector<32x1xf32>
    %38 = math.absf %27 : vector<32x1xf32>
    %cst_22 = arith.constant 0.000000e+00 : f32
    %39 = vector.broadcast %cst_22 : f32 to vector<32x1xf32>
    %40 = arith.subf %39, %38 : vector<32x1xf32>
    %41 = math.exp %40 : vector<32x1xf32>
    %42 = math.log1p %41 : vector<32x1xf32>
    %43 = arith.addf %37, %42 : vector<32x1xf32>
    %cst_23 = arith.constant 0.000000e+00 : f32
    %44 = vector.broadcast %cst_23 : f32 to vector<32x1xf32>
    %45 = arith.select %35, %43, %44 : vector<32x1xi1>, vector<32x1xf32>
    %c0_24 = arith.constant 0 : index
    %c0_25 = arith.constant 0 : index
    %c0_26 = arith.constant 0 : index
    %46 = vector.load %arg12[%c0_24, %c0_25, %c0_26] : memref<1x1x1xf32, #tpu.memory_space<vmem>>, vector<1x1x1xf32>
    %47 = vector.shape_cast %45 : vector<32x1xf32> to vector<1x32x1xf32>
    %cst_27 = arith.constant dense<0.000000e+00> : vector<1xf32>
    %48 = vector.multi_reduction <add>, %47, %cst_27 [1, 2] : vector<1x32x1xf32> to vector<1xf32>
    %49 = vector.shape_cast %48 : vector<1xf32> to vector<1x1x1xf32>
    %50 = vector.extract %49[0, 0, 0] : f32 from vector<1x1x1xf32>
    %cst_28 = arith.constant 1.562500e-02 : f32
    %51 = arith.mulf %cst_28, %50 : f32
    %52 = vector.broadcast %51 : f32 to vector<1x1x1xf32>
    %53 = arith.addf %46, %52 : vector<1x1x1xf32>
    %c0_29 = arith.constant 0 : index
    %c0_30 = arith.constant 0 : index
    %c0_31 = arith.constant 0 : index
    %54 = vector.load %arg12[%c0_29, %c0_30, %c0_31] : memref<1x1x1xf32, #tpu.memory_space<vmem>>, vector<1x1x1xf32>
    tpu.vector_store %arg12[%c0_29, %c0_30, %c0_31], %53 {strides = array<i32>} : memref<1x1x1xf32, #tpu.memory_space<vmem>>, vector<1x1x1xf32>,
    %c0_i32_32 = arith.constant 0 : i32
    %55 = arith.cmpi eq, %arg1, %c0_i32_32 : i32
    %56 = arith.extui %55 : i1 to i32
    %c0_i32_33 = arith.constant 0 : i32
    %57 = arith.cmpi ne, %56, %c0_i32_33 : i32
    scf.if %57 {
      %c0_34 = arith.constant 0 : index
      %c0_35 = arith.constant 0 : index
      %c0_36 = arith.constant 0 : index
      %58 = vector.load %arg12[%c0_34, %c0_35, %c0_36] : memref<1x1x1xf32, #tpu.memory_space<vmem>>, vector<1x1x1xf32>
      %c0_37 = arith.constant 0 : index
      %c0_38 = arith.constant 0 : index
      %c0_39 = arith.constant 0 : index
      %59 = vector.load %arg11[%c0_37, %c0_38, %c0_39] : memref<1x1x1xf32, #tpu.memory_space<vmem>>, vector<1x1x1xf32>
      tpu.vector_store %arg11[%c0_37, %c0_38, %c0_39], %58 {strides = array<i32>} : memref<1x1x1xf32, #tpu.memory_space<vmem>>, vector<1x1x1xf32>,
    } else {
    }
    return
  }
  func.func @transform_0(%arg0: i32, %arg1: i32) -> (i32, i32) {
    %c1_i32 = arith.constant 1 : i32
    %0 = arith.muli %arg0, %c1_i32 : i32
    %1 = arith.addi %0, %arg1 : i32
    %c0_i32 = arith.constant 0 : i32
    %2 = arith.minsi %1, %c0_i32 : i32
    %c0_i32_0 = arith.constant 0 : i32
    %c0_i32_1 = arith.constant 0 : i32
    return %2, %c0_i32_0 : i32, i32
  }
  func.func @transform_1(%arg0: i32, %arg1: i32) -> (i32, i32) {
    %c1_i32 = arith.constant 1 : i32
    %0 = arith.muli %arg0, %c1_i32 : i32
    %1 = arith.addi %0, %arg1 : i32
    %c0_i32 = arith.constant 0 : i32
    %2 = arith.minsi %1, %c0_i32 : i32
    %c0_i32_0 = arith.constant 0 : i32
    %c0_i32_1 = arith.constant 0 : i32
    return %2, %c0_i32_0 : i32, i32
  }
  func.func @transform_2(%arg0: i32, %arg1: i32) -> (i32, i32) {
    %c0_i32 = arith.constant 0 : i32
    %c0_i32_0 = arith.constant 0 : i32
    %c0_i32_1 = arith.constant 0 : i32
    return %c0_i32, %c0_i32_0 : i32, i32
  }
  func.func @transform_3(%arg0: i32, %arg1: i32) -> (i32, i32) {
    %c0_i32 = arith.constant 0 : i32
    %c0_i32_0 = arith.constant 0 : i32
    %c0_i32_1 = arith.constant 0 : i32
    return %c0_i32, %c0_i32_0 : i32, i32
  }
  func.func @transform_4(%arg0: i32, %arg1: i32) -> (i32, i32) {
    %c0_i32 = arith.constant 0 : i32
    %c0_i32_0 = arith.constant 0 : i32
    %c0_i32_1 = arith.constant 0 : i32
    return %c0_i32, %c0_i32_0 : i32, i32
  }
  func.func @transform_5(%arg0: i32, %arg1: i32) -> (i32, i32) {
    %c0_i32 = arith.constant 0 : i32
    %c0_i32_0 = arith.constant 0 : i32
    %c0_i32_1 = arith.constant 0 : i32
    return %c0_i32, %c0_i32_0 : i32, i32
  }
  func.func @transform_6(%arg0: i32, %arg1: i32) -> (i32, i32) {
    %c0_i32 = arith.constant 0 : i32
    %c0_i32_0 = arith.constant 0 : i32
    %c0_i32_1 = arith.constant 0 : i32
    return %c0_i32, %c0_i32_0 : i32, i32
  }
  func.func @transform_7(%arg0: i32, %arg1: i32) -> (i32, i32) {
    %c0_i32 = arith.constant 0 : i32
    %c0_i32_0 = arith.constant 0 : i32
    %c0_i32_1 = arith.constant 0 : i32
    return %c0_i32, %c0_i32_0 : i32, i32
  }
  func.func @transform_8(%arg0: i32, %arg1: i32) -> (i32, i32) {
    %c0_i32 = arith.constant 0 : i32
    %c0_i32_0 = arith.constant 0 : i32
    %c0_i32_1 = arith.constant 0 : i32
    return %c0_i32, %c0_i32_0 : i32, i32
  }
  func.func @transform_9(%arg0: i32, %arg1: i32) -> (i32, i32, i32) {
    %c0_i32 = arith.constant 0 : i32
    %c0_i32_0 = arith.constant 0 : i32
    %c0_i32_1 = arith.constant 0 : i32
    return %arg0, %c0_i32, %c0_i32_0 : i32, i32, i32
  }
}

</mosaic_0001>

<bundles_post_ra>
// kernel: tpu_custom_call.1
= control target key start
LH: loop header
LB: loop body
LE: loop exit
PB: predicated region body
PF: predicated region fallthrough
CT: control target
= control target key end

     0   :  { %15 = vsyncpa [#allocation5], 0  ;;  %s1623_s0 = inlined_call_operand.hbm [shape: f32[32,128], index: 0, kind: input, shape index: {}]   ;;  %s1624_s1 = inlined_call_operand.hbm [shape: f32[32,128], index: 1, kind: input, shape index: {}]   ;;  %s1625_s2 = inlined_call_operand.hbm [shape: f32[8,128], index: 2, kind: input, shape index: {}]   ;;  %s1626_s3 = inlined_call_operand.hbm [shape: f32[8,128], index: 3, kind: input, shape index: {}]   ;;  %s1627_s4 = inlined_call_operand.hbm [shape: f32[128,128], index: 4, kind: input, shape index: {}]   ;;  %s1628_s5 = inlined_call_operand.hbm [shape: f32[128,128], index: 5, kind: input, shape index: {}]   ;;  %s1629_s6 = inlined_call_operand.hbm [shape: f32[1,128], index: 6, kind: input, shape index: {}]   ;;  %s1630_s7 = inlined_call_operand.hbm [shape: f32[1,128], index: 7, kind: input, shape index: {}]   ;;  %s1631_s8 = inlined_call_operand.<no memory space> [shape: f32[1,1], index: 8, kind: input, shape index: {}]   ;;  %s1632_s9 = inlined_call_operand.hbm [shape: f32[1,1,1], index: 9, kind: output, shape index: {}]  }
   0x1   :  { %16 = vsyncpa [#allocation8], 0 }
   0x2   :  { %17 = vsyncpa [#allocation11], 0 }
   0x3   :  { %18 = vsyncpa [#allocation14], 0 }
   0x4   :  { %19 = vsyncpa [#allocation17], 0 }
   0x5   :  { %20 = vsyncpa [#allocation6], 0  ;;  %s1364_s30 = smov [#allocation7]   ;;  %s1365_s11 = smov [#allocation10]  }
   0x6   :  { %s50_s10 = sshll.u32 %s1364_s30, 4  ;;  %s73_s12 = sshll.u32 %s1365_s11, 4  ;;  %s51_s10 = int_to_ptr.vmem [resolvable:$true] %s50_s10  ;;  %s74_s12 = int_to_ptr.vmem [resolvable:$true] %s73_s12 }
   0x7   :  { %s1154_s15 = scalar_lea.hbm %s1624_s1, 512 }
   0x8   :  { %p1155_p0 = scmp.ne.s32.totalorder %s1624_s1, %s1154_s15  ;;  %p1158_p1 = scmp.lt.u32.totalorder %s1154_s15, %s1624_s1 }
   0xa   :  { %p1160_p2 = pnand %p1158_p1, %p1155_p0 }
   0xc   :  { %1163 = shalt.err (!%p1160_p2)
}
   0xd   :  { %s1164_s20 = scalar_lea.vmem %s51_s10, 512  ;;  %p1169_p4 = scmp.lt.s32.totalorder %s51_s10, %s51_s10 }
   0xe   :  { %p1165_p3 = scmp.ne.s32.totalorder %s51_s10, %s1164_s20  ;;  %p1170_p5 = scmp.lt.s32.totalorder %s1164_s20, %s1164_s20 }
  0x10   :  { %p1171_p6 = por %p1170_p5, %p1169_p4 }
  0x12   :  { %p1172_p7 = pnand %p1171_p6, %p1165_p3 }
  0x14   :  { %1175 = shalt.err (!%p1172_p7)
}
  0x15   :  { %s1366_s21 = smov 128   ;;  %s1367_s22 = smov 8  }
  0x16   :  { %56 = dma.hbm_to_vmem [thread:$0]  %s1624_s1, 512, %s51_s10, [#allocation8], %s1366_s21, %s1366_s21, %s1367_s22  }
  0x17   :  { %s1176_s27 = scalar_lea.hbm %s1626_s3, 128 }
  0x18   :  { %p1177_p8 = scmp.ne.s32.totalorder %s1626_s3, %s1176_s27  ;;  %p1180_p9 = scmp.lt.u32.totalorder %s1176_s27, %s1626_s3 }
  0x1a   :  { %p1182_p10 = pnand %p1180_p9, %p1177_p8 }
  0x1c   :  { %1185 = shalt.err (!%p1182_p10)
}
  0x1d   :  { %s1186_s13 = scalar_lea.vmem %s74_s12, 128  ;;  %p1191_p12 = scmp.lt.s32.totalorder %s74_s12, %s74_s12 }
  0x1e   :  { %p1187_p11 = scmp.ne.s32.totalorder %s74_s12, %s1186_s13  ;;  %p1192_p13 = scmp.lt.s32.totalorder %s1186_s13, %s1186_s13 }
  0x20   :  { %p1193_p0 = por %p1192_p13, %p1191_p12 }
  0x22   :  { %p1194_p1 = pnand %p1193_p0, %p1187_p11 }
  0x24   :  { %1197 = shalt.err (!%p1194_p1)
}
  0x25   :  { %76 = dma.hbm_to_vmem [thread:$0]  %s1626_s3, 128, %s74_s12, [#allocation11]  }
  0x26   :  { %s1368_s14 = smov [#allocation13]   ;;  %s1369_s16 = smov [#allocation4]  }
  0x27   :  { %s94_s15 = sshll.u32 %s1368_s14, 4  ;;  %s32_s17 = sshll.u32 %s1369_s16, 4  ;;  %s95_s15 = int_to_ptr.vmem [resolvable:$true] %s94_s15  ;;  %s1455_s17 = int_to_ptr.vmem [resolvable:$true] %s32_s17 }
  0x28   :  { %s1198_s20 = scalar_lea.hbm %s1628_s5, 2048 }
  0x29   :  { %p1199_p2 = scmp.ne.s32.totalorder %s1628_s5, %s1198_s20  ;;  %p1202_p3 = scmp.lt.u32.totalorder %s1198_s20, %s1628_s5 }
  0x2b   :  { %p1204_p4 = pnand %p1202_p3, %p1199_p2 }
  0x2d   :  { %1207 = shalt.err (!%p1204_p4)
}
  0x2e   :  { %s1208_s3 = scalar_lea.vmem %s95_s15, 2048  ;;  %p1213_p6 = scmp.lt.s32.totalorder %s95_s15, %s95_s15 }
  0x2f   :  { %p1209_p5 = scmp.ne.s32.totalorder %s95_s15, %s1208_s3  ;;  %p1214_p7 = scmp.lt.s32.totalorder %s1208_s3, %s1208_s3 }
  0x31   :  { %p1215_p8 = por %p1214_p7, %p1213_p6 }
  0x33   :  { %p1216_p9 = pnand %p1215_p8, %p1209_p5 }
  0x35   :  { %1219 = shalt.err (!%p1216_p9)
}
  0x36   :  { %100 = dma.hbm_to_vmem [thread:$0]  %s1628_s5, 2048, %s95_s15, [#allocation14], %s1366_s21, %s1366_s21, %s1367_s22  }
  0x37   :  { %s1220_s30 = scalar_lea.hbm %s1623_s0, 512 }
  0x38   :  { %p1221_p10 = scmp.ne.s32.totalorder %s1623_s0, %s1220_s30  ;;  %p1224_p11 = scmp.lt.u32.totalorder %s1220_s30, %s1623_s0 }
  0x3a   :  { %p1226_p12 = pnand %p1224_p11, %p1221_p10 }
  0x3c   :  { %1229 = shalt.err (!%p1226_p12)
}
  0x3d   :  { %s1230_s14 = scalar_lea.vmem %s1455_s17, 512  ;;  %p1235_p0 = scmp.lt.s32.totalorder %s1455_s17, %s1455_s17 }
  0x3e   :  { %p1231_p13 = scmp.ne.s32.totalorder %s1455_s17, %s1230_s14  ;;  %p1236_p1 = scmp.lt.s32.totalorder %s1230_s14, %s1230_s14 }
  0x40   :  { %p1237_p2 = por %p1236_p1, %p1235_p0 }
  0x42   :  { %p1238_p3 = pnand %p1237_p2, %p1231_p13 }
  0x44   :  { %1241 = shalt.err (!%p1238_p3)
}
  0x45   :  { %38 = dma.hbm_to_vmem [thread:$0]  %s1623_s0, 512, %s1455_s17, [#allocation5], %s1366_s21, %s1366_s21, %s1367_s22  }
  0x46   :  { %s1370_s16 = smov [#allocation9]   ;;  %s1371_s19 = smov [#allocation12]  }
  0x47   :  { %s63_s18 = sshll.u32 %s1370_s16, 4  ;;  %s82_s20 = sshll.u32 %s1371_s19, 4  ;;  %s64_s18 = int_to_ptr.vmem [resolvable:$true] %s63_s18  ;;  %s1492_s20 = int_to_ptr.vmem [resolvable:$true] %s82_s20 }
  0x48   :  { %s1242_s25 = scalar_lea.hbm %s1625_s2, 128 }
  0x49   :  { %p1243_p4 = scmp.ne.s32.totalorder %s1625_s2, %s1242_s25  ;;  %p1246_p5 = scmp.lt.u32.totalorder %s1242_s25, %s1625_s2 }
  0x4b   :  { %p1248_p6 = pnand %p1246_p5, %p1243_p4 }
  0x4d   :  { %1251 = shalt.err (!%p1248_p6)
}
  0x4e   :  { %s1252_s0 = scalar_lea.vmem %s64_s18, 128  ;;  %p1257_p8 = scmp.lt.s32.totalorder %s64_s18, %s64_s18 }
  0x4f   :  { %p1253_p7 = scmp.ne.s32.totalorder %s64_s18, %s1252_s0  ;;  %p1258_p9 = scmp.lt.s32.totalorder %s1252_s0, %s1252_s0 }
  0x51   :  { %p1259_p10 = por %p1258_p9, %p1257_p8 }
  0x53   :  { %p1260_p11 = pnand %p1259_p10, %p1253_p7 }
  0x55   :  { %1263 = shalt.err (!%p1260_p11)
}
  0x56   :  { %66 = dma.hbm_to_vmem [thread:$0]  %s1625_s2, 128, %s64_s18, [#allocation8]  }
  0x57   :  { %s1264_s11 = scalar_lea.hbm %s1627_s4, 2048 }
  0x58   :  { %p1265_p12 = scmp.ne.s32.totalorder %s1627_s4, %s1264_s11  ;;  %p1268_p13 = scmp.lt.u32.totalorder %s1264_s11, %s1627_s4 }
  0x5a   :  { %p1270_p0 = pnand %p1268_p13, %p1265_p12 }
  0x5c   :  { %1273 = shalt.err (!%p1270_p0)
}
  0x5d   :  { %s1274_s5 = scalar_lea.vmem %s1492_s20, 2048  ;;  %p1279_p2 = scmp.lt.s32.totalorder %s1492_s20, %s1492_s20 }
  0x5e   :  { %p1275_p1 = scmp.ne.s32.totalorder %s1492_s20, %s1274_s5  ;;  %p1280_p3 = scmp.lt.s32.totalorder %s1274_s5, %s1274_s5 }
  0x60   :  { %p1281_p4 = por %p1280_p3, %p1279_p2 }
  0x62   :  { %p1282_p5 = pnand %p1281_p4, %p1275_p1 }
  0x64   :  { %1285 = shalt.err (!%p1282_p5)
}
  0x65   :  { %88 = dma.hbm_to_vmem [thread:$0]  %s1627_s4, 2048, %s1492_s20, [#allocation11], %s1366_s21, %s1366_s21, %s1367_s22  }
  0x66   :  { %s1372_s16 = smov [#allocation15]   ;;  %s1373_s19 = smov [#allocation16]  }
  0x67   :  { %s107_s18 = sshll.u32 %s1372_s16, 4  ;;  %s117_s23 = sshll.u32 %s1373_s19, 4  ;;  %s108_s18 = int_to_ptr.vmem [resolvable:$true] %s107_s18  ;;  %s118_s23 = int_to_ptr.vmem [resolvable:$true] %s117_s23 }
  0x68   :  { %s1286_s26 = scalar_lea.hbm %s1629_s6, 16 }
  0x69   :  { %p1287_p6 = scmp.ne.s32.totalorder %s1629_s6, %s1286_s26  ;;  %p1290_p7 = scmp.lt.u32.totalorder %s1286_s26, %s1629_s6 }
  0x6b   :  { %p1292_p8 = pnand %p1290_p7, %p1287_p6 }
  0x6d   :  { %1295 = shalt.err (!%p1292_p8)
}
  0x6e   :  { %s1296_s4 = scalar_lea.vmem %s108_s18, 16  ;;  %s1300_s21 = scalar_lea.vmem %s108_s18, 32 }
  0x6f   :  { %p1297_p9 = scmp.ne.s32.totalorder %s108_s18, %s1296_s4  ;;  %p1301_p10 = scmp.lt.s32.totalorder %s108_s18, %s108_s18 }
  0x70   :  { %p1302_p11 = scmp.lt.s32.totalorder %s1300_s21, %s1296_s4 }
  0x72   :  { %p1303_p12 = por %p1302_p11, %p1301_p10 }
  0x74   :  { %p1304_p13 = pnand %p1303_p12, %p1297_p9 }
  0x76   :  { %1307 = shalt.err (!%p1304_p13)
}
  0x77   :  { %110 = dma.hbm_to_vmem [thread:$0]  %s1629_s6, 16, %s108_s18, [#allocation14]  }
  0x78   :  { %s1308_s29 = scalar_lea.hbm %s1630_s7, 16 }
  0x79   :  { %p1309_p0 = scmp.ne.s32.totalorder %s1630_s7, %s1308_s29  ;;  %p1312_p1 = scmp.lt.u32.totalorder %s1308_s29, %s1630_s7 }
  0x7b   :  { %p1314_p2 = pnand %p1312_p1, %p1309_p0 }
  0x7d   :  { %1317 = shalt.err (!%p1314_p2)
}
  0x7e   :  { %s1318_s10 = scalar_lea.vmem %s118_s23, 16  ;;  %s1322_s14 = scalar_lea.vmem %s118_s23, 32 }
  0x7f   :  { %p1319_p3 = scmp.ne.s32.totalorder %s118_s23, %s1318_s10  ;;  %p1323_p4 = scmp.lt.s32.totalorder %s118_s23, %s118_s23 }
  0x80   :  { %p1324_p5 = scmp.lt.s32.totalorder %s1322_s14, %s1318_s10 }
  0x82   :  { %p1325_p6 = por %p1324_p5, %p1323_p4 }
  0x84   :  { %p1326_p7 = pnand %p1325_p6, %p1319_p3 }
  0x86   :  { %1329 = shalt.err (!%p1326_p7)
}
  0x87   :  { %120 = dma.hbm_to_vmem [thread:$0]  %s1630_s7, 16, %s118_s23, [#allocation17]  }
  0x88   :  { %1352 = dma.done.wait [#allocation5], 512  }
  0x89   :  { %1353 = vsyncadd [#allocation5], 4294966784 }
  0x8a   :  { %1354 = dma.done.wait [#allocation8], 640  }
  0x8b   :  { %1355 = vsyncadd [#allocation8], 4294966656 }
  0x8c   :  { %1356 = dma.done.wait [#allocation11], 2176  }
  0x8d   :  { %1357 = vsyncadd [#allocation11], 4294965120 }
  0x8e   :  { %1358 = dma.done.wait [#allocation14], 2064  }
  0x8f   :  { %1359 = vsyncadd [#allocation14], 4294965232 }
  0x90   :  { %1360 = dma.done.wait [#allocation17], 16  }
  0x91   :  { %1361 = vsyncadd [#allocation17], 4294967280  ;;  %vm159_vm0 = vcmask 0   ;;  %v1374_v0 = vmov 0.0|0.0   ;;  %v1375_v1 = vmov 0.0   ;;  %vm1376_vm1 = vmmov 0  }
  0x92   :  { %1000 = vmatprep.subr.bf16.mxu1 %v1374_v0  ;;  %160 = vst.msk [vmem:[#allocation2] sm:$0x1] %vm159_vm0, %v1375_v1  ;;  %886 = vmatprep.mubr.msk.f32.mxu1 %vm1376_vm1, %v1375_v1  ;;  %v184_v2 = vld [vmem:[#allocation13] sm:$0xff]  ;;  %v185_v3 = vld [vmem:[#allocation13 + $0x8] sm:$0xff]  ;;  %v186_v4 = vld [vmem:[#allocation13 + $0x10] sm:$0xff]  ;;  %vm379_vm2 = vcmask 7168  }
  0x93   :  { %v1001_v5 = vpack.c.bf16 %v185_v3, %v184_v2  ;;  %v187_v6 = vld [vmem:[#allocation13 + $0x18] sm:$0xff]  ;;  %v188_v8 = vld [vmem:[#allocation13 + $0x20] sm:$0xff]  ;;  %v189_v9 = vld [vmem:[#allocation13 + $0x28] sm:$0xff]  ;;  %s1377_s19 = smov [#allocation18]  }
  0x94   :  { %v1004_v7 = vpack.c.bf16 %v187_v6, %v186_v4  ;;  %v1007_v10 = vpack.c.bf16 %v189_v9, %v188_v8  ;;  %v190_v11 = vld [vmem:[#allocation13 + $0x30] sm:$0xff]  ;;  %v191_v12 = vld [vmem:[#allocation13 + $0x38] sm:$0xff]  ;;  %v192_v15 = vld [vmem:[#allocation13 + $0x40] sm:$0xff]  ;;  %s759_s23 = sshll.u32 %s1377_s19, 4  ;;  %s760_s23 = int_to_ptr.vmem [resolvable:$true] %s759_s23 }
  0x95   :  { %1002 = vmatpush3.bf16.msra.mxu1 %v1001_v5  ;;  %1049 = vmatprep.subr.bf16.mxu0 %v1001_v5  ;;  %v399_v13 = vld [vmem:[#allocation7] sm:$0xff]  ;;  %v1010_v14 = vpack.c.bf16 %v191_v12, %v190_v11  ;;  %v193_v16 = vld [vmem:[#allocation13 + $0x48] sm:$0xff]  ;;  %v195_v19 = vld [vmem:[#allocation13 + $0x58] sm:$0xff]  ;;  %s1330_s24 = scalar_lea.vmem %s760_s23, 16  ;;  %s1334_s25 = scalar_lea.vmem %s760_s23, 32 }
  0x96   :  { %1051 = vmatpush3.bf16.msra.mxu0 %v1001_v5  ;;  %1003 = vmatprep.subr.bf16.mxu1 %v1374_v0  ;;  %v1013_v17 = vpack.c.bf16 %v193_v16, %v192_v15  ;;  %v194_v18 = vld [vmem:[#allocation13 + $0x50] sm:$0xff]  ;;  %v196_v21 = vld [vmem:[#allocation13 + $0x60] sm:$0xff]  ;;  %v197_v22 = vld [vmem:[#allocation13 + $0x68] sm:$0xff]  ;;  %p1331_p8 = scmp.ne.s32.totalorder %s760_s23, %s1330_s24  ;;  %p1335_p9 = scmp.lt.s32.totalorder %s760_s23, %s760_s23 }
  0x97   :  { %1053 = vmatprep.subr.bf16.mxu0 %v1004_v7  ;;  %956 = vmatprep.mubr.f32.mxu0 %v399_v13  ;;  %v1016_v20 = vpack.c.bf16 %v195_v19, %v194_v18  ;;  %v1019_v23 = vpack.c.bf16 %v197_v22, %v196_v21  ;;  %v198_v24 = vld [vmem:[#allocation13 + $0x70] sm:$0xff]  ;;  %v199_v25 = vld [vmem:[#allocation13 + $0x78] sm:$0xff]  ;;  %v168_v27 = vld [vmem:[#allocation12] sm:$0xff]  ;;  %v360_v22 = vstv %s1631_s8  ;;  %p1336_p10 = scmp.lt.s32.totalorder %s1334_s25, %s1330_s24 }
  0x98   :  { %v1022_v26 = vpack.c.bf16 %v199_v25, %v198_v24  ;;  %v169_v28 = vld [vmem:[#allocation12 + $0x8] sm:$0xff]  ;;  %v170_v30 = vld [vmem:[#allocation12 + $0x10] sm:$0xff]  ;;  %v171_v31 = vld [vmem:[#allocation12 + $0x18] sm:$0xff] }
  0x99   :  { %1005 = vmatpush3.bf16.msra.mxu1 %v1004_v7  ;;  %v1025_v29 = vpack.c.bf16 %v169_v28, %v168_v27  ;;  %v167_v32 = vld [vmem:[#allocation10] sm:$0xff]  ;;  %v1028_v34 = vpack.c.bf16 %v171_v31, %v170_v30  ;;  %v172_v35 = vld [vmem:[#allocation12 + $0x20] sm:$0xff]  ;;  %v173_v36 = vld [vmem:[#allocation12 + $0x28] sm:$0xff]  ;;  %p1337_p11 = por %p1336_p10, %p1335_p9 }
  0x9a   :  { %1055 = vmatpush3.bf16.msra.mxu0 %v1004_v7  ;;  %1006 = vmatprep.subr.bf16.mxu1 %v1374_v0  ;;  %v400_v33 = vld [vmem:[#allocation7 + $0x8] sm:$0xff]  ;;  %v401_v37 = vld [vmem:[#allocation7 + $0x10] sm:$0xff]  ;;  %v402_v38 = vld [vmem:[#allocation7 + $0x18] sm:$0xff]  ;;  %v1031_v39 = vpack.c.bf16 %v173_v36, %v172_v35 }
  0x9b   :  { %1057 = vmatprep.subr.bf16.mxu0 %v1007_v10  ;;  %v174_v40 = vld [vmem:[#allocation12 + $0x30] sm:$0xff]  ;;  %v175_v41 = vld [vmem:[#allocation12 + $0x38] sm:$0xff]  ;;  %v176_v44 = vld [vmem:[#allocation12 + $0x40] sm:$0xff]  ;;  %p1338_p12 = pnand %p1337_p11, %p1331_p8 }
  0x9c   :  { %v395_v42 = vld [vmem:[#allocation4] sm:$0xff]  ;;  %v1034_v43 = vpack.c.bf16 %v175_v41, %v174_v40  ;;  %v177_v45 = vld [vmem:[#allocation12 + $0x48] sm:$0xff]  ;;  %v179_v48 = vld [vmem:[#allocation12 + $0x58] sm:$0xff] }
  0x9d   :  { %1008 = vmatpush3.bf16.msra.mxu1 %v1007_v10  ;;  %v1037_v46 = vpack.c.bf16 %v177_v45, %v176_v44  ;;  %v178_v47 = vld [vmem:[#allocation12 + $0x50] sm:$0xff]  ;;  %v180_v50 = vld [vmem:[#allocation12 + $0x60] sm:$0xff]  ;;  %v181_v51 = vld [vmem:[#allocation12 + $0x68] sm:$0xff] }
  0x9e   :  { %1059 = vmatpush3.bf16.msra.mxu0 %v1007_v10  ;;  %1009 = vmatprep.subr.bf16.mxu1 %v1374_v0  ;;  %v1040_v49 = vpack.c.bf16 %v179_v48, %v178_v47  ;;  %v1043_v52 = vpack.c.bf16 %v181_v51, %v180_v50  ;;  %v182_v53 = vld [vmem:[#allocation12 + $0x70] sm:$0xff]  ;;  %v183_v54 = vld [vmem:[#allocation12 + $0x78] sm:$0xff]  ;;  %v397_v58 = vld [vmem:[#allocation4 + $0x10] sm:$0xff] }
  0x9f   :  { %1061 = vmatprep.subr.bf16.mxu0 %v1010_v14  ;;  %v1046_v55 = vpack.c.bf16 %v183_v54, %v182_v53  ;;  %v166_v56 = vld [vmem:[#allocation9] sm:$0xff]  ;;  %v396_v57 = vld [vmem:[#allocation4 + $0x8] sm:$0xff]  ;;  %v398_v59 = vld [vmem:[#allocation4 + $0x18] sm:$0xff] }
  0xa0   :  { %v778_v62 = vld [vmem:[#allocation15] ss:$0 sm:$0xff]  ;;  %v779_v6 = vld [vmem:[#allocation16] ss:$0 sm:$0xff] }
  0xa1   :  { %1011 = vmatpush3.bf16.msra.mxu1 %v1010_v14 }
  0xa2   :  { %1063 = vmatpush3.bf16.msra.mxu0 %v1010_v14  ;;  %1012 = vmatprep.subr.bf16.mxu1 %v1374_v0 }
  0xa3   :  { %1065 = vmatprep.subr.bf16.mxu0 %v1013_v17 }
  0xa5   :  { %1014 = vmatpush3.bf16.msra.mxu1 %v1013_v17 }
  0xa6   :  { %1067 = vmatpush3.bf16.msra.mxu0 %v1013_v17  ;;  %1015 = vmatprep.subr.bf16.mxu1 %v1374_v0 }
  0xa7   :  { %1069 = vmatprep.subr.bf16.mxu0 %v1016_v20 }
  0xa9   :  { %1017 = vmatpush3.bf16.msra.mxu1 %v1016_v20 }
  0xaa   :  { %1071 = vmatpush3.bf16.msra.mxu0 %v1016_v20  ;;  %1018 = vmatprep.subr.bf16.mxu1 %v1374_v0 }
  0xab   :  { %1073 = vmatprep.subr.bf16.mxu0 %v1019_v23 }
  0xad   :  { %1020 = vmatpush3.bf16.msra.mxu1 %v1019_v23 }
  0xae   :  { %1075 = vmatpush3.bf16.msra.mxu0 %v1019_v23  ;;  %1021 = vmatprep.subr.bf16.mxu1 %v1374_v0 }
  0xaf   :  { %1077 = vmatprep.subr.bf16.mxu0 %v1022_v26 }
  0xb1   :  { %1023 = vmatpush3.bf16.msra.mxu1 %v1022_v26 }
  0xb2   :  { %1079 = vmatpush3.bf16.msra.mxu0 %v1022_v26  ;;  %1024 = vmatprep.subr.bf16.mxu1 %v1374_v0 }
  0xb3   :  { %1081 = vmatprep.subr.bf16.mxu0 %v1025_v29 }
  0xb4   :  { %887 = vmatmul.mubr.f32.vlgmr.msra.gmra.mrb[0].mxu1 %v167_v32 }
  0xb5   :  { %1026 = vmatpush3.bf16.msra.mxu1 %v1025_v29  ;;  %957 = vmatmul.mubr.f32.vlgmr.msra.gmra.mrb[0].mxu0 %v400_v33 }
  0xb6   :  { %1083 = vmatpush3.bf16.msra.mxu0 %v1025_v29  ;;  %1027 = vmatprep.subr.bf16.mxu1 %v1374_v0 }
  0xb7   :  { %1085 = vmatprep.subr.bf16.mxu0 %v1028_v34  ;;  %959 = vmatprep.mubr.f32.mxu0 %v401_v37 }
  0xb8   :  { %921 = vmatprep.mubr.msk.f32.mxu1 %vm1376_vm1, %v1375_v1 }
  0xb9   :  { %1029 = vmatpush3.bf16.msra.mxu1 %v1028_v34  ;;  %960 = vmatmul.mubr.f32.gmra.mrb[2].mxu0 %v402_v38 }
  0xba   :  { %1087 = vmatpush3.bf16.msra.mxu0 %v1028_v34  ;;  %1030 = vmatprep.subr.bf16.mxu1 %v1374_v0 }
  0xbb   :  { %1089 = vmatprep.subr.bf16.mxu0 %v1031_v39  ;;  %994 = vmatprep.mubr.f32.mxu0 %v395_v42 }
  0xbd   :  { %1032 = vmatpush3.bf16.msra.mxu1 %v1031_v39 }
  0xbe   :  { %1091 = vmatpush3.bf16.msra.mxu0 %v1031_v39  ;;  %1033 = vmatprep.subr.bf16.mxu1 %v1374_v0 }
  0xbf   :  { %1093 = vmatprep.subr.bf16.mxu0 %v1034_v43 }
  0xc1   :  { %1035 = vmatpush3.bf16.msra.mxu1 %v1034_v43 }
  0xc2   :  { %1095 = vmatpush3.bf16.msra.mxu0 %v1034_v43  ;;  %1036 = vmatprep.subr.bf16.mxu1 %v1374_v0 }
  0xc3   :  { %1097 = vmatprep.subr.bf16.mxu0 %v1037_v46 }
  0xc5   :  { %1038 = vmatpush3.bf16.msra.mxu1 %v1037_v46 }
  0xc6   :  { %1099 = vmatpush3.bf16.msra.mxu0 %v1037_v46  ;;  %1039 = vmatprep.subr.bf16.mxu1 %v1374_v0 }
  0xc7   :  { %1101 = vmatprep.subr.bf16.mxu0 %v1040_v49 }
  0xc9   :  { %1041 = vmatpush3.bf16.msra.mxu1 %v1040_v49 }
  0xca   :  { %1103 = vmatpush3.bf16.msra.mxu0 %v1040_v49  ;;  %1042 = vmatprep.subr.bf16.mxu1 %v1374_v0 }
  0xcb   :  { %1105 = vmatprep.subr.bf16.mxu0 %v1043_v52 }
  0xcd   :  { %1044 = vmatpush3.bf16.msra.mxu1 %v1043_v52 }
  0xce   :  { %1107 = vmatpush3.bf16.msra.mxu0 %v1043_v52  ;;  %1045 = vmatprep.subr.bf16.mxu1 %v1374_v0 }
  0xcf   :  { %1109 = vmatprep.subr.bf16.mxu0 %v1046_v55 }
  0xd1   :  { %1047 = vmatpush3.bf16.msra.mxu1 %v1046_v55 }
  0xd2   :  { %1111 = vmatpush3.bf16.msra.mxu0 %v1046_v55 }
  0xd4   :  { %922 = vmatmul.mubr.f32.vlgmr.msra.gmra.mrb[2].mxu1 %v166_v56 }
  0xd5   :  { %995 = vmatmul.mubr.f32.vlgmr.msra.gmra.mrb[0].mxu0 %v396_v57 }
  0xd6   :  { %997 = vmatprep.mubr.f32.mxu0 %v397_v58 }
  0xd9   :  { %998 = vmatmul.mubr.f32.gmra.mrb[2].mxu0 %v398_v59 }
 0x187   :  { %v266_v60 = vpop.f32.mrb[0].mxu1 }
 0x188   :  { %v888_v61 = vpop.f32.mrb[1].mxu1 }
 0x1a7   :  { %v336_v63 = vpop.f32.mrb[2].mxu1 }
 0x1a8   :  { %v337_v1 = vadd.f32 %v336_v63, %v266_v60  ;;  %v923_v2 = vpop.f32.mrb[3].mxu1  ;;  %v996_v3 = vpop.f32.mrb[0].mxu0 }
 0x1a9   :  { %v613_v4 = vadd.f32 %v996_v3, %v778_v62  ;;  %v586_v0 = vpop.f32.mrb[1].mxu0 }
 0x1aa   :  { %v612_v5 = vadd.f32 %v778_v62, %v586_v0  ;;  %v347_v7 = vadd.f32 %v778_v62, %v337_v1 }
 0x1ab   :  { %v617_v8 = vmax.f32 %v613_v4, 0.0 }
 0x1ac   :  { %v999_v9 = vpop.f32.mrb[2].mxu0  ;;  %v348_v10 = vmax.f32 %v347_v7, 0.0  ;;  %v616_v13 = vmax.f32 %v612_v5, 0.0 }
 0x1ad   :  { %v596_v11 = vpop.f32.mrb[3].mxu0  ;;  %v628_v12 = vmul.f32 %v779_v6, %v617_v8  ;;  %v615_v14 = vadd.f32 %v999_v9, %v778_v62 }
 0x1ae   :  { %v614_v15 = vadd.f32 %v778_v62, %v596_v11  ;;  %v356_v16 = vmul.f32 %v779_v6, %v348_v10  ;;  %v627_v20 = vmul.f32 %v779_v6, %v616_v13 }
 0x1af   :  { %633 = vadd.xlane.f32.xlu1 %v628_v12  ;;  %v619_v18 = vmax.f32 %v615_v14, 0.0 }
 0x1b0   :  { %v618_v17 = vmax.f32 %v614_v15, 0.0  ;;  %357 = vadd.xlane.f32.xlu0 %v356_v16 }
 0x1b1   :  { %v630_v21 = vmul.f32 %v779_v6, %v619_v18 }
 0x1b2   :  { %v629_v19 = vmul.f32 %v779_v6, %v618_v17 }
 0x1b4   :  { %635 = vadd.xlane.f32.xlu1 %v629_v19  ;;  %631 = vadd.xlane.f32.xlu0 %v627_v20 }
 0x1b8   :  { %637 = vadd.xlane.f32.xlu0 %v630_v21 }
 0x23c   :  { %v634_v23 = vpop.xlane.xlu1 %633 }
 0x23d   :  { %v1575_v24 = vadd.f32 %v634_v23, %v360_v22  ;;  %v358_v25 = vpop.xlane.xlu0 %357 }
 0x23e   :  { %v361_v26 = vadd.f32 %v360_v22, %v358_v25 }
 0x23f   :  { %v666_v27 = vand.u32 2147483647, %v1575_v24  ;;  %v662_v9 = vmax.f32 %v1575_v24, 0.0 }
 0x240   :  { %v363_v28 = vsub.f32 0.0, %v361_v26 }
 0x241   :  { %v670_v29 = vsub.f32 0.0, %v666_v27  ;;  %v636_v30 = vpop.xlane.xlu1 %635  ;;  %v632_v31 = vpop.xlane.xlu0 %631 }
 0x242   :  { %v365_v32 = vand.u32 2147483647, %v363_v28  ;;  %v1578_v33 = vadd.f32 %v636_v30, %v360_v22  ;;  %v1580_v34 = vadd.f32 %v632_v31, %v360_v22  ;;  %v364_v11 = vmax.f32 %v363_v28, 0.0 }
 0x243   :  { %v675_v35 = vmul.f32 1.442695, %v670_v29 }
 0x244   :  { %v366_v36 = vsub.f32 0.0, %v365_v32  ;;  %v667_v37 = vand.u32 2147483647, %v1578_v33  ;;  %v665_v38 = vand.u32 2147483647, %v1580_v34  ;;  %v663_v19 = vmax.f32 %v1578_v33, 0.0 }
 0x245   :  { %1134 = vpow2.f32 %v675_v35  ;;  %v638_v39 = vpop.xlane.xlu0 %637  ;;  %v661_v32 = vmax.f32 %v1580_v34, 0.0 }
 0x246   :  { %v367_v40 = vmul.f32 1.442695, %v366_v36  ;;  %v671_v41 = vsub.f32 0.0, %v667_v37  ;;  %v1584_v42 = vadd.f32 %v638_v39, %v360_v22  ;;  %v669_v43 = vsub.f32 0.0, %v665_v38 }
 0x248   :  { %1136 = vpow2.f32 %v367_v40  ;;  %v677_v44 = vmul.f32 1.442695, %v671_v41  ;;  %v668_v45 = vand.u32 2147483647, %v1584_v42  ;;  %v673_v46 = vmul.f32 1.442695, %v669_v43 }
 0x249   :  { %v664_v41 = vmax.f32 %v1584_v42, 0.0 }
 0x24a   :  { %1138 = vpow2.f32 %v677_v44  ;;  %v672_v47 = vsub.f32 0.0, %v668_v45 }
 0x24b   :  { %1140 = vpow2.f32 %v673_v46 }
 0x24c   :  { %v679_v48 = vmul.f32 1.442695, %v672_v47 }
 0x24e   :  { %1142 = vpow2.f32 %v679_v48 }
 0x24f   :  { %v1135_v49 = vpop.eup %1134 }
 0x250   :  { %v690_v50 = vadd.f32 1.0, %v1135_v49  ;;  %v693_v57 = vmul.f32 -0.5, %v1135_v49  ;;  %v696_v2 = vand.u32 2147483647, %v1135_v49 }
 0x252   :  { %v1137_v51 = vpop.eup %1136  ;;  %1144 = vlog2.f32 %v690_v50  ;;  %v694_v62 = vadd.f32 1.0, %v693_v57  ;;  %vm1588_vm3 = vcmp.lt.f32.partialorder %v696_v2, 0.0004427343 }
 0x253   :  { %v369_v52 = vadd.f32 1.0, %v1137_v51  ;;  %v372_v59 = vmul.f32 -0.5, %v1137_v51  ;;  %v375_v5 = vand.u32 2147483647, %v1137_v51 }
 0x254   :  { %v1139_v53 = vpop.eup %1138  ;;  %v695_v10 = vmul.f32 %v1135_v49, %v694_v62 }
 0x255   :  { %v1141_v54 = vpop.eup %1140  ;;  %v699_v55 = vadd.f32 1.0, %v1139_v53  ;;  %1146 = vlog2.f32 %v369_v52  ;;  %v702_v61 = vmul.f32 -0.5, %v1139_v53  ;;  %v373_v3 = vadd.f32 1.0, %v372_v59 }
 0x256   :  { %v681_v56 = vadd.f32 1.0, %v1141_v54  ;;  %v684_v63 = vmul.f32 -0.5, %v1141_v54  ;;  %v705_v0 = vand.u32 2147483647, %v1139_v53  ;;  %v687_v14 = vand.u32 2147483647, %v1141_v54 }
 0x257   :  { %1148 = vlog2.f32 %v699_v55  ;;  %v703_v6 = vadd.f32 1.0, %v702_v61  ;;  %v374_v16 = vmul.f32 %v1137_v51, %v373_v3  ;;  %vm376_vm5 = vcmp.lt.f32.partialorder %v375_v5, 0.0004427343 }
 0x258   :  { %v1143_v58 = vpop.eup %1142  ;;  %1150 = vlog2.f32 %v681_v56  ;;  %v685_v12 = vadd.f32 1.0, %v684_v63  ;;  %vm1595_vm4 = vcmp.lt.f32.partialorder %v705_v0, 0.0004427343  ;;  %vm688_vm6 = vcmp.lt.f32.partialorder %v687_v14, 0.0004427343 }
 0x259   :  { %v708_v60 = vadd.f32 1.0, %v1143_v58  ;;  %v711_v7 = vmul.f32 -0.5, %v1143_v58  ;;  %v704_v23 = vmul.f32 %v1139_v53, %v703_v6  ;;  %v714_v29 = vand.u32 2147483647, %v1143_v58 }
 0x25a   :  { %v686_v27 = vmul.f32 %v1141_v54, %v685_v12 }
 0x25b   :  { %1152 = vlog2.f32 %v708_v60  ;;  %v712_v25 = vadd.f32 1.0, %v711_v7  ;;  %vm715_vm7 = vcmp.lt.f32.partialorder %v714_v29, 0.0004427343 }
 0x25c   :  { %v1145_v1 = vpop.eup %1144 }
 0x25d   :  { %v692_v4 = vmul.f32 0.6931472, %v1145_v1  ;;  %v713_v40 = vmul.f32 %v1143_v58, %v712_v25  ;;  %v362_v1 = vld [vmem:[#allocation2] sm:$0x1] }
 0x25f   :  { %v1147_v8 = vpop.eup %1146  ;;  %v698_v18 = vsel %vm1588_vm3, %v695_v10, %v692_v4 }
 0x260   :  { %v371_v15 = vmul.f32 0.6931472, %v1147_v8  ;;  %v718_v30 = vadd.f32 %v698_v18, %v662_v9 }
 0x261   :  { %v1149_v17 = vpop.eup %1148 }
 0x262   :  { %v1151_v21 = vpop.eup %1150  ;;  %v701_v22 = vmul.f32 0.6931472, %v1149_v17  ;;  %v377_v24 = vsel %vm376_vm5, %v374_v16, %v371_v15  ;;  %v728_v45 = vsel %vm379_vm2, %v718_v30, 0.0 }
 0x263   :  { %v683_v26 = vmul.f32 0.6931472, %v1151_v21  ;;  %v378_v28 = vadd.f32 %v377_v24, %v364_v11 }
 0x264   :  { %v707_v31 = vsel %vm1595_vm4, %v704_v23, %v701_v22 }
 0x265   :  { %v1153_v33 = vpop.eup %1152  ;;  %v689_v35 = vsel %vm688_vm6, %v686_v27, %v683_v26  ;;  %v380_v36 = vsel %vm379_vm2, %v378_v28, 0.0  ;;  %v719_v37 = vadd.f32 %v707_v31, %v663_v19 }
 0x266   :  { %v717_v38 = vadd.f32 %v689_v35, %v661_v32  ;;  %381 = vadd.xlane.f32.xlu1 %v380_v36  ;;  %v710_v39 = vmul.f32 0.6931472, %v1153_v33 }
 0x267   :  { %v730_v47 = vsel %vm379_vm2, %v719_v37, 0.0 }
 0x268   :  { %v716_v43 = vsel %vm715_vm7, %v713_v40, %v710_v39  ;;  %v727_v44 = vsel %vm379_vm2, %v717_v38, 0.0 }
 0x269   :  { %v720_v46 = vadd.f32 %v716_v43, %v664_v41  ;;  %v729_v34 = vadd.f32 %v728_v45, %v727_v44 }
 0x26b   :  { %v731_v48 = vadd.f32 %v730_v47, %v729_v34  ;;  %v732_v49 = vsel %vm379_vm2, %v720_v46, 0.0 }
 0x26d   :  { %v733_v50 = vadd.f32 %v732_v49, %v731_v48 }
 0x26f   :  { %734 = vadd.xlane.f32.xlu0 %v733_v50 }
 0x2f3   :  { %v382_v51 = vpop.xlane.xlu1 %381 }
 0x2f4   :  { %v383_v52 = vrot.slane %v382_v51, 4 }
 0x2f6   :  { %v384_v53 = vadd.f32 %v383_v52, %v382_v51 }
 0x2f8   :  { %v385_v54 = vrot.slane %v384_v53, 2 }
 0x2fa   :  { %v386_v42 = vadd.f32 %v385_v54, %v384_v53 }
 0x2fc   :  { %v735_v55 = vpop.xlane.xlu0 %734  ;;  %v387_v56 = vrot.slane %v386_v42, 1 }
 0x2fd   :  { %v736_v57 = vrot.slane %v735_v55, 4 }
 0x2fe   :  { %v388_v58 = vadd.f32 %v387_v56, %v386_v42 }
 0x2ff   :  { %v737_v59 = vadd.f32 %v736_v57, %v735_v55 }
 0x300   :  { %1116 = vpush %v388_v58 }
 0x301   :  { %v738_v60 = vrot.slane %v737_v59, 2 }
 0x303   :  { %v739_v61 = vadd.f32 %v738_v60, %v737_v59 }
 0x305   :  { %v740_v62 = vrot.slane %v739_v61, 1 }
 0x307   :  { %v741_v63 = vadd.f32 %v740_v62, %v739_v61 }
 0x309   :  { %1118 = vpush %v741_v63 }
 0x331   :  { %s1117_s8 = spop %1116 }
 0x332   :  { %s390_s15 = smul.f32 0.0625, %s1117_s8 }
 0x334   :  { %v391_v2 = vstv %s390_s15 }
 0x335   :  { %v392_v3 = vadd.f32 %v391_v2, %v362_v1 }
 0x337   :  { %394 = vst.msk [vmem:[#allocation2] sm:$0x1] %vm159_vm0, %v392_v3 }
 0x33a   :  { %s1119_s16 = spop %1118 }
 0x33b   :  { %s743_s18 = smul.f32 0.015625, %s1119_s16 }
 0x33d   :  { %v744_v0 = vstv %s743_s18 }
 0x33e   :  { %v725_v4 = vld [vmem:[#allocation2] sm:$0x1] }
 0x33f   :  { %v745_v5 = vadd.f32 %v744_v0, %v725_v4 }
 0x341   :  { %747 = vst.msk [vmem:[#allocation2] sm:$0x1] %vm159_vm0, %v745_v5 }
 0x348   :  { %v751_v6 = vld [vmem:[#allocation2] sm:$0x1] }
 0x349   :  { %752 = vst.msk [vmem:[#allocation18] sm:$0x1] %vm159_vm0, %v751_v6 }
 0x34a   :  { %1341 = shalt.err (!%p1338_p12)
}
 0x34b   :  { %s1342_s12 = scalar_lea.hbm %s1632_s9, 16 }
 0x34c   :  { %p1343_p13 = scmp.ne.s32.totalorder %s1632_s9, %s1342_s12  ;;  %p1346_p0 = scmp.lt.u32.totalorder %s1342_s12, %s1632_s9 }
 0x34e   :  { %p1348_p1 = pnand %p1346_p0, %p1343_p13 }
 0x350   :  { %1351 = shalt.err (!%p1348_p1)
}
 0x351   :  { %762 = dma.vmem_to_hbm [thread:$0]  %s760_s23, 16, %s1632_s9, [#allocation6]  }
 0x352   :  { %1362 = dma.done.wait [#allocation6], 16  }
 0x353   :  { %1363 = vsyncadd [#allocation6], 4294967280 }
 0x354   :  { %766 = vsyncpa [#allocation5], 1 }
 0x355   :  { %767 = vsyncpa [#allocation8], 1 }
 0x356   :  { %768 = vsyncpa [#allocation11], 1 }
 0x357   :  { %769 = vsyncpa [#allocation14], 1 }
 0x358   :  { %770 = vsyncpa [#allocation17], 1 }
 0x359   :  { %771 = vsyncpa [#allocation6], 1 }

</bundles_post_ra>
